<compile_context>
chip_gen: v5e
topology: v5e:2x2
jax: 0.10.0
libtpu: 0.0.40
codegen_flags: <defaults>
</compile_context>

<pallas_src>
import jax
import jax.numpy as jnp
from jax.experimental import pallas as pl
from jax.experimental.pallas import tpu as pltpu

_LANE = 128
_SUBLANE = 8


def linear_fma_kernel(params_ref, x_ref, o_ref):
    # params_ref: SMEM f32[2] = [weight, bias]; x_ref/o_ref: VMEM (tm, 128) tiles.
    w = params_ref[0]
    b = params_ref[1]
    x = x_ref[...].astype(jnp.float32)
    o_ref[...] = (x * w + b).astype(o_ref.dtype)  # pure VPU FMA, lane-dense


def _round_up(v, m):
    return ((v + m - 1) // m) * m


def _choose_tm(rows, block_rows):
    """Row-tile height: multiple of 8 (or == rows), <= block_rows, prefer >= 2 blocks."""
    if rows <= _SUBLANE:
        return rows  # single block equal to the full array (satisfies the (8,128) rule)
    # Target >= 2 blocks so v7x's two TensorCores both get work; cap at block_rows
    # (1 MiB/block at 2048 rows) to stay near the HBM roofline without VMEM pressure.
    tm = _round_up(pl.cdiv(rows, 2), _SUBLANE)
    return min(tm, block_rows, _round_up(rows, _SUBLANE))


def linear_forward(x, weight, bias, *, block_rows=2048):
    """Pallas implementation of nn.Linear(1, 1) forward: y = x * w + b.

    x: (N, 1), weight: (1, 1), bias: (1,) -> returns (N, 1).
    """
    n, in_features = x.shape
    out_features, _ = weight.shape
    assert in_features == 1 and out_features == 1, "kernel specialized for Linear(1, 1)"

    rows = max(1, pl.cdiv(n, _LANE))
    tm = _choose_tm(rows, block_rows)
    grid = pl.cdiv(rows, tm)  # Pallas masks the partial final block; no row padding.

    ragged = (n % _LANE) != 0
    if ragged:
        # Pad only up to the next multiple of 128 lanes (single small pad op).
        x_slab = jnp.pad(x.reshape(-1), (0, rows * _LANE - n)).reshape(rows, _LANE)
    else:
        # Free metadata reshape: no pad, no extra HBM pass.
        x_slab = x.reshape(rows, _LANE)

    # Scalar params -> f32 SMEM (one sld each inside the kernel; f32 accumulation).
    params = jnp.concatenate([weight.reshape(-1), bias.reshape(-1)]).astype(jnp.float32)

    out_slab = pl.pallas_call(
        linear_fma_kernel,
        out_shape=jax.ShapeDtypeStruct((rows, _LANE), x.dtype),
        grid=(grid,),
        in_specs=[
            pl.BlockSpec(memory_space=pltpu.MemorySpace.SMEM),   # params, untiled
            pl.BlockSpec((tm, _LANE), lambda i: (i, 0)),          # x row-block
        ],
        out_specs=pl.BlockSpec((tm, _LANE), lambda i: (i, 0)),    # y row-block
        compiler_params=pltpu.CompilerParams(
            dimension_semantics=("parallel",),
        ),
        cost_estimate=pl.CostEstimate(
            flops=2 * rows * _LANE, transcendentals=0, bytes_accessed=8 * rows * _LANE
        ),
    )(params, x_slab)

    if ragged:
        return out_slab.reshape(-1)[:n].reshape(n, out_features)
    return out_slab.reshape(n, out_features)


if __name__ == "__main__":
    input_size = 1
    output_size = 1

    key = jax.random.PRNGKey(0)
    kx, kw, kb = jax.random.split(key, 3)

    # Deterministic synthetic parameters (shapes from nn.Linear(1, 1)).
    # PyTorch init is U(-1/sqrt(in), 1/sqrt(in)); reproduce the distribution bounds.
    bound = 1.0 / (input_size ** 0.5)
    weight = jax.random.uniform(kw, (output_size, input_size),
                                minval=-bound, maxval=bound, dtype=jnp.float32)
    bias = jax.random.uniform(kb, (output_size,),
                              minval=-bound, maxval=bound, dtype=jnp.float32)

    # Cover the ragged path (batch=8), the lane-aligned fast path (batch=256),
    # and a multi-block grid (batch=4096 -> rows=32, grid=2).
    for batch in (8, 256, 4096):
        x = jax.random.normal(kx, (batch, input_size), dtype=jnp.float32)
        out = jax.block_until_ready(linear_forward(x, weight, bias))
        ref = x @ weight.T + bias
        assert out.shape == (batch, output_size)
        assert jnp.allclose(out, ref, atol=1e-6, rtol=1e-6)

    print("KERNEL_OK")
</pallas_src>

<mosaic_0001>
module attributes {stable_mosaic.version = 11 : i64} {
  func.func @linear_fma_kernel(%arg0: i32, %arg1: memref<2xf32, #tpu.memory_space<smem>>, %arg2: memref<1x128xf32, #tpu.memory_space<vmem>>, %arg3: memref<1x128xf32, #tpu.memory_space<vmem>>) attributes {dimension_semantics = [#tpu.dimension_semantics<parallel>], iteration_bounds = array<i64: 1>, scalar_prefetch = 0 : i64, scratch_operands = 0 : i64, tpu.core_type = #tpu.core_type<tc>, window_params = [{transform_indices = @transform_0, window_bounds = array<i64: 2>}, {transform_indices = @transform_1, window_bounds = array<i64: 1, 128>}, {transform_indices = @transform_2, window_bounds = array<i64: 1, 128>}]} {
    %c0 = arith.constant 0 : index
    %0 = memref.load %arg1[%c0] : memref<2xf32, #tpu.memory_space<smem>>
    %c1 = arith.constant 1 : index
    %1 = memref.load %arg1[%c1] : memref<2xf32, #tpu.memory_space<smem>>
    %c0_0 = arith.constant 0 : index
    %c0_1 = arith.constant 0 : index
    %2 = vector.load %arg2[%c0_0, %c0_1] : memref<1x128xf32, #tpu.memory_space<vmem>>, vector<1x128xf32>
    %3 = vector.broadcast %0 : f32 to vector<1x128xf32>
    %4 = arith.mulf %2, %3 : vector<1x128xf32>
    %5 = vector.broadcast %1 : f32 to vector<1x128xf32>
    %6 = arith.addf %4, %5 : vector<1x128xf32>
    %c0_2 = arith.constant 0 : index
    %c0_3 = arith.constant 0 : index
    %7 = vector.load %arg3[%c0_2, %c0_3] : memref<1x128xf32, #tpu.memory_space<vmem>>, vector<1x128xf32>
    tpu.vector_store %arg3[%c0_2, %c0_3], %6 {strides = array<i32>} : memref<1x128xf32, #tpu.memory_space<vmem>>, vector<1x128xf32>,
    return
  }
  func.func @transform_0(%arg0: i32) -> i32 {
    %c0_i32 = arith.constant 0 : i32
    %c0_i32_0 = arith.constant 0 : i32
    return %c0_i32 : i32
  }
  func.func @transform_1(%arg0: i32) -> (i32, i32) {
    %c0_i32 = arith.constant 0 : i32
    %c0_i32_0 = arith.constant 0 : i32
    return %arg0, %c0_i32 : i32, i32
  }
  func.func @transform_2(%arg0: i32) -> (i32, i32) {
    %c0_i32 = arith.constant 0 : i32
    %c0_i32_0 = arith.constant 0 : i32
    return %arg0, %c0_i32 : i32, i32
  }
}

</mosaic_0001>

<bundles_post_ra>
// kernel: tpu_custom_call.1
= control target key start
LH: loop header
LB: loop body
LE: loop exit
PB: predicated region body
PF: predicated region fallthrough
CT: control target
= control target key end

     0   :  { %7 = vsyncpa [#allocation5], 0  ;;  %s162_s0 = inlined_call_operand.hbm [shape: f32[2], index: 0, kind: input, shape index: {}]   ;;  %s163_s1 = inlined_call_operand.hbm [shape: f32[1,128], index: 1, kind: input, shape index: {}]   ;;  %s164_s2 = inlined_call_operand.hbm [shape: f32[1,128], index: 2, kind: output, shape index: {}]  }
   0x1   :  { %8 = vsyncpa [#allocation3], 0 }
   0x2   :  { %9 = vsyncpa [#allocation4], 0  ;;  %s15_s11 = sshll.u32 %s162_s0, 4  ;;  %s24_s14 = sshll.u32 %s163_s1, 4  ;;  %s16_s11 = int_to_ptr.hbm [resolvable:$true] %s15_s11  ;;  %s25_s14 = int_to_ptr.hbm [resolvable:$true] %s24_s14 }
   0x3   :  { %s135_s15 = smov [#allocation2]   ;;  %s136_s16 = smov [#allocation6]  }
   0x4   :  { %18 = dma.hbm_to_smem %s16_s11, 16, %s135_s15, [#allocation5]  }
   0x5   :  { %s26_s17 = sshll.u32 %s136_s16, 4  ;;  %s27_s17 = int_to_ptr.vmem [resolvable:$true] %s26_s17 }
   0x6   :  { %29 = dma.hbm_to_vmem [thread:$0]  %s25_s14, 16, %s27_s17, [#allocation3]  }
   0x7   :  { %129 = dma.done.wait [#allocation5], 16  }
   0x8   :  { %130 = vsyncadd [#allocation5], 4294967280 }
   0x9   :  { %131 = dma.done.wait [#allocation3], 16  }
   0xa   :  { %132 = vsyncadd [#allocation3], 4294967280 }
   0xb   :  { %38 = sfence }
   0xc   :  { %s39_s18 = sld [smem:[#allocation2]]  ;;  %v41_v0 = vld [vmem:[#allocation6] sm:$0x1]  ;;  %s137_s0 = smov [#allocation7]  }
   0xd   :  { %s65_s19 = sld [smem:[#allocation2 + $0x1]]  ;;  %s52_s20 = sshll.u32 %s137_s0, 4  ;;  %s53_s20 = int_to_ptr.vmem [resolvable:$true] %s52_s20 }
   0xe   :  { %s54_s22 = sshll.u32 %s164_s2, 4  ;;  %s55_s22 = int_to_ptr.hbm [resolvable:$true] %s54_s22 }
  0x12   :  { %v42_v1 = vstv %s39_s18 }
  0x13   :  { %v43_v2 = vmul.f32 %v42_v1, %v41_v0  ;;  %v44_v3 = vstv %s65_s19 }
  0x15   :  { %v45_v4 = vadd.f32 %v44_v3, %v43_v2 }
  0x17   :  { %46 = vst [vmem:[#allocation7] sm:$0x1] %v45_v4 }
  0x18   :  { %57 = dma.vmem_to_hbm [thread:$0]  %s53_s20, 16, %s55_s22, [#allocation4]  }
  0x19   :  { %133 = dma.done.wait [#allocation4], 16  }
  0x1a   :  { %134 = vsyncadd [#allocation4], 4294967280 }
  0x1b   :  { %62 = vsyncpa [#allocation3], 1 }
  0x1c   :  { %63 = vsyncpa [#allocation4], 1 }
  0x1d   :  { %64 = vsyncpa [#allocation5], 1 }

</bundles_post_ra>
